<compile_context>
chip_gen: v5e
topology: v5e:2x2
jax: 0.10.0
libtpu: 0.0.40
codegen_flags: <defaults>
</compile_context>

<pallas_src>
import functools

import jax
import jax.numpy as jnp
from jax import lax
from jax.experimental import pallas as pl
from jax.experimental.pallas import tpu as pltpu

_NEG_BIG = -1e30  # finite sentinel for masked scores (keeps exp/lse inf-free)


def _round_up(x, m):
    return ((x + m - 1) // m) * m


def _mnrl_kernel(a_ref, cand_ref, diag_ref, pid_row_ref, row_idx_ref,
                 id_col_ref, col_idx_ref, inv_col_ref,
                 out_ref,
                 an_scr, m_scr, l_scr,
                 *, scale, c_valid):
    c = pl.program_id(1)
    nc = pl.num_programs(1)

    @pl.when(c == 0)
    def _init():
        # Normalize + scale the anchor tile once per row tile; cache in the
        # matmul dtype so every column step feeds the MXU directly.
        a = a_ref[...].astype(jnp.float32)
        ss = jnp.sum(a * a, axis=-1, keepdims=True)
        a_n = a * lax.rsqrt(jnp.maximum(ss, 1e-24)) * scale
        an_scr[...] = a_n.astype(an_scr.dtype)
        # Online-logsumexp state.
        m_scr[...] = jnp.full_like(m_scr, _NEG_BIG)
        l_scr[...] = jnp.zeros_like(l_scr)

    # Raw candidate tile straight into the MXU; per-candidate inverse L2 norm
    # is a (1, tc) broadcast on the score tile (commutes with the matmul).
    s = lax.dot_general(an_scr[...], cand_ref[...],
                        dimension_numbers=(((1,), (1,)), ((), ())),
                        preferred_element_type=jnp.float32)        # (tb, tc)
    s = s * inv_col_ref[...]

    same_id = pid_row_ref[...] == id_col_ref[...]                  # (tb, tc)
    off_diag = row_idx_ref[...] != col_idx_ref[...]                # (tb, tc)
    padded = col_idx_ref[...] >= c_valid                           # (1, tc)
    s = jnp.where((same_id & off_diag) | padded, _NEG_BIG, s)

    # Online logsumexp update.
    m_prev = m_scr[...]
    m_new = jnp.maximum(m_prev, jnp.max(s, axis=-1, keepdims=True))
    alpha = jnp.exp(m_prev - m_new)
    l_scr[...] = alpha * l_scr[...] + jnp.sum(jnp.exp(s - m_new),
                                              axis=-1, keepdims=True)
    m_scr[...] = m_new

    @pl.when(c == nc - 1)
    def _finalize():
        # Per-row CE loss = logsumexp(row) - positive (diagonal) logit.
        # TODO(synk): a row whose candidates are ALL masked (degenerate input)
        # yields a finite garbage loss here instead of the reference inf/nan.
        out_ref[...] = m_scr[...] + jnp.log(l_scr[...]) - diag_ref[...]


def _vmem_cap_bytes():
    try:
        info = pltpu.get_tpu_info()
        cap = getattr(info, "vmem_capacity_bytes", None)
        if cap:
            return int(cap)
    except Exception:
        pass
    return 64 * 1024 * 1024  # v7x-safe default


def _blk_bytes(rows, cols, itemsize):
    # VMEM blocks are tiled to (8, 128) granularity.
    return _round_up(max(rows, 1), 8) * _round_up(max(cols, 1), 128) * itemsize


def mnrl_loss(anchor_embs, pos_embs, neg_embs, pos_ids, neg_ids,
              scale=50.0, block_b=512, block_c=512, matmul_dtype=None):
    """Pallas TPU CustomMultipleNegativesRankingLoss forward.

    Embeddings are fed to the MXU in their incoming dtype (pass bf16, or set
    matmul_dtype=jnp.bfloat16, for the bf16 MXU path); normalization, masking
    and the softmax/CE epilogue run in f32.
    """
    B, D = anchor_embs.shape
    N = neg_embs.shape[0]
    C = B + N
    dot_dtype = jnp.dtype(anchor_embs.dtype if matmul_dtype is None
                          else matmul_dtype)

    # ---- tile sizes --------------------------------------------------------
    block_b = max(int(block_b), 8)
    block_c = max(int(block_c), 128)
    tc = min(_round_up(block_c, 128), _round_up(C, 128))   # lane-aligned
    b_r8 = _round_up(B, 8)
    if b_r8 <= _round_up(block_b, 8):
        # Whole batch fits one requested row tile: still split into two row
        # tiles so the "parallel" grid axis can span both v7x TensorCores.
        tb = _round_up((B + 1) // 2, 8) if B > 8 else b_r8
    else:
        # 256-granularity fills the 256-wide MXU on v6e/v7x (also a multiple
        # of 128 for v5e's 128-wide MXU).
        tb = (block_b // 256) * 256 if block_b >= 256 else _round_up(block_b, 8)

    Dp = _round_up(D, 128)
    Bp = _round_up(B, tb)
    Cp = _round_up(C, tc)
    nb = Bp // tb
    ncols = Cp // tc

    # ---- one-time wrapper precompute (O(C*D), cheap vs. the (B x C) matmul)
    cand = jnp.concatenate([pos_embs, neg_embs], axis=0)               # (C, D)
    ids = jnp.concatenate([pos_ids.astype(jnp.int32),
                           neg_ids.astype(jnp.int32)], axis=0)         # (C,)

    c32 = cand.astype(jnp.float32)
    inv_col = lax.rsqrt(jnp.maximum(jnp.sum(c32 * c32, axis=-1), 1e-24))  # (C,)

    a32 = anchor_embs.astype(jnp.float32)
    p32 = pos_embs.astype(jnp.float32)
    a_n = a32 * lax.rsqrt(jnp.maximum(jnp.sum(a32 * a32, -1, keepdims=True),
                                      1e-24))
    p_n = p32 * lax.rsqrt(jnp.maximum(jnp.sum(p32 * p32, -1, keepdims=True),
                                      1e-24))
    diag = scale * jnp.sum(a_n * p_n, axis=-1, keepdims=True)          # (B, 1)

    if cand.dtype != dot_dtype:
        cand = cand.astype(dot_dtype)

    # ---- padding -----------------------------------------------------------
    def _pad2(x, rows, cols, val=0):
        r, c0 = x.shape
        if r == rows and c0 == cols:
            return x
        return jnp.pad(x, ((0, rows - r), (0, cols - c0)), constant_values=val)

    a_p = _pad2(anchor_embs, Bp, Dp)
    cand_p = _pad2(cand, Cp, Dp)
    diag_p = _pad2(diag, Bp, 1)
    pid_row = _pad2(pos_ids.astype(jnp.int32).reshape(B, 1), Bp, 1, val=-1)
    row_idx = jnp.arange(Bp, dtype=jnp.int32).reshape(Bp, 1)
    id_col = _pad2(ids.reshape(1, C), 1, Cp, val=-1)
    col_idx = jnp.arange(Cp, dtype=jnp.int32).reshape(1, Cp)
    inv_col_p = _pad2(inv_col.reshape(1, C), 1, Cp)

    # ---- VMEM budget: double-buffered blocks + scratch + headroom ----------
    a_isz = jnp.dtype(anchor_embs.dtype).itemsize
    c_isz = jnp.dtype(cand_p.dtype).itemsize
    vmem_bytes = 2 * (_blk_bytes(tb, Dp, a_isz)        # anchor tile
                      + _blk_bytes(tc, Dp, c_isz)      # candidate tile
                      + 4 * _blk_bytes(tb, 1, 4)       # diag, pid_row, row_idx, out
                      + 3 * _blk_bytes(1, tc, 4))      # id_col, col_idx, inv_col
    vmem_bytes += _blk_bytes(tb, Dp, dot_dtype.itemsize)   # anchor scratch
    vmem_bytes += 2 * _blk_bytes(tb, 1, 4)                 # m, l scratch
    vmem_limit = min(max(vmem_bytes + 2 * 1024 * 1024, 16 * 1024 * 1024),
                     (_vmem_cap_bytes() * 7) // 8)

    kernel = functools.partial(_mnrl_kernel, scale=float(scale), c_valid=C)

    per_row = pl.pallas_call(
        kernel,
        out_shape=jax.ShapeDtypeStruct((Bp, 1), jnp.float32),
        grid_spec=pltpu.PrefetchScalarGridSpec(
            num_scalar_prefetch=0,
            grid=(nb, ncols),
            in_specs=[
                # anchor row tile, resident across the whole column sweep
                pl.BlockSpec((tb, Dp), lambda i, c: (i, 0)),
                # single concatenated candidate stream (pos then neg), raw
                # NOTE: add pipeline_mode=pl.Buffered(3) here only if profiling
                # shows exposed DMA at row-tile boundaries.
                pl.BlockSpec((tc, Dp), lambda i, c: (c, 0)),
                # precomputed positive (diagonal) logit per row
                pl.BlockSpec((tb, 1), lambda i, c: (i, 0)),
                # ids / indices (tiny, resident per row tile / per col tile)
                pl.BlockSpec((tb, 1), lambda i, c: (i, 0)),
                pl.BlockSpec((tb, 1), lambda i, c: (i, 0)),
                pl.BlockSpec((1, tc), lambda i, c: (0, c)),
                pl.BlockSpec((1, tc), lambda i, c: (0, c)),
                # precomputed per-candidate inverse L2 norm
                pl.BlockSpec((1, tc), lambda i, c: (0, c)),
            ],
            out_specs=pl.BlockSpec((tb, 1), lambda i, c: (i, 0)),
            scratch_shapes=[
                pltpu.VMEM((tb, Dp), dot_dtype),   # normalized+scaled anchor
                pltpu.VMEM((tb, 1), jnp.float32),  # online max m
                pltpu.VMEM((tb, 1), jnp.float32),  # online sum l
            ],
        ),
        compiler_params=pltpu.CompilerParams(
            dimension_semantics=("parallel", "arbitrary"),
            vmem_limit_bytes=int(vmem_limit),
        ),
    )(a_p, cand_p, diag_p, pid_row, row_idx, id_col, col_idx, inv_col_p)

    # CrossEntropyLoss 'mean' reduction over the real rows.
    return jnp.mean(per_row[:B, 0])


def _reference_loss(anchor_embs, pos_embs, neg_embs, pos_ids, neg_ids, scale=50.0):
    # Plain-JAX f32 reference mirroring the PyTorch module.
    anchor_embs = anchor_embs.astype(jnp.float32)
    pos_embs = pos_embs.astype(jnp.float32)
    neg_embs = neg_embs.astype(jnp.float32)
    cand = jnp.concatenate([pos_embs, neg_embs], axis=0)
    ids = jnp.concatenate([pos_ids, neg_ids], axis=0)
    a_n = anchor_embs / jnp.maximum(
        jnp.linalg.norm(anchor_embs, axis=-1, keepdims=True), 1e-12)
    c_n = cand / jnp.maximum(jnp.linalg.norm(cand, axis=-1, keepdims=True), 1e-12)
    scores = jnp.matmul(a_n, c_n.T, precision=jax.lax.Precision.HIGHEST) * scale
    B = scores.shape[0]
    mask = pos_ids[:, None] == ids[None, :]
    diag_idx = jnp.arange(B)
    mask = mask.at[diag_idx, diag_idx].set(False)
    scores = jnp.where(mask, -jnp.inf, scores)
    lse = jax.scipy.special.logsumexp(scores, axis=-1)
    return jnp.mean(lse - scores[diag_idx, diag_idx])


if __name__ == "__main__":
    # --- Test 1: toy shapes (matches the module's typical small batch) -------
    key = jax.random.PRNGKey(0)
    B, N, D = 8, 8, 32
    k1, k2, k3 = jax.random.split(key, 3)
    anchor = jax.random.normal(k1, (B, D), dtype=jnp.float32)
    pos = jax.random.normal(k2, (B, D), dtype=jnp.float32)
    neg = jax.random.normal(k3, (N, D), dtype=jnp.float32)
    pos_ids = jnp.arange(B, dtype=jnp.int32)
    neg_ids = jnp.array([0, 1, 100, 101, 2, 102, 103, 3], dtype=jnp.int32)

    loss = mnrl_loss(anchor, pos, neg, pos_ids, neg_ids)
    jax.block_until_ready(loss)
    ref = _reference_loss(anchor, pos, neg, pos_ids, neg_ids)
    assert jnp.allclose(loss, ref, rtol=1e-2, atol=1e-2), (loss, ref)

    # --- Test 2: default tiles on a medium batch (row tile auto-split so the
    #     parallel axis has >= 2 tiles), padding on B / N / D, duplicate +
    #     colliding ids ------------------------------------------------------
    B2, N2, D2 = 160, 200, 64
    k1, k2, k3, k4 = jax.random.split(jax.random.PRNGKey(1), 4)
    anchor2 = jax.random.normal(k1, (B2, D2), dtype=jnp.float32)
    pos2 = jax.random.normal(k2, (B2, D2), dtype=jnp.float32)
    neg2 = jax.random.normal(k3, (N2, D2), dtype=jnp.float32)
    pos_ids2 = jnp.arange(B2, dtype=jnp.int32).at[7].set(3)        # duplicate pos id
    neg_ids2 = jax.random.randint(k4, (N2,), 0, 250, dtype=jnp.int32)  # collisions

    ref2 = _reference_loss(anchor2, pos2, neg2, pos_ids2, neg_ids2)

    loss2 = mnrl_loss(anchor2, pos2, neg2, pos_ids2, neg_ids2)
    jax.block_until_ready(loss2)
    assert jnp.allclose(loss2, ref2, rtol=1e-2, atol=1e-2), (loss2, ref2)

    # --- Test 2b: forced multi-tile grid (5 row tiles, 3 column tiles) ------
    loss2b = mnrl_loss(anchor2, pos2, neg2, pos_ids2, neg_ids2,
                       block_b=32, block_c=128)
    jax.block_until_ready(loss2b)
    assert jnp.allclose(loss2b, ref2, rtol=1e-2, atol=1e-2), (loss2b, ref2)

    # --- Test 3: bf16 embeddings -> bf16 MXU operands, f32 accumulation ------
    loss3 = mnrl_loss(anchor2.astype(jnp.bfloat16), pos2.astype(jnp.bfloat16),
                      neg2.astype(jnp.bfloat16), pos_ids2, neg_ids2,
                      block_b=32, block_c=128)
    jax.block_until_ready(loss3)
    ref3 = _reference_loss(anchor2.astype(jnp.bfloat16), pos2.astype(jnp.bfloat16),
                           neg2.astype(jnp.bfloat16), pos_ids2, neg_ids2)
    assert jnp.isfinite(loss3), loss3
    assert jnp.allclose(loss3, ref3, rtol=0.1, atol=0.3), (loss3, ref3)

    print("KERNEL_OK")
</pallas_src>

<mosaic_0001>
module attributes {stable_mosaic.version = 11 : i64} {
  func.func @_mnrl_kernel(%arg0: i32, %arg1: i32, %arg2: memref<8x128xf32, #tpu.memory_space<vmem>>, %arg3: memref<128x128xf32, #tpu.memory_space<vmem>>, %arg4: memref<8x1xf32, #tpu.memory_space<vmem>>, %arg5: memref<8x1xi32, #tpu.memory_space<vmem>>, %arg6: memref<8x1xi32, #tpu.memory_space<vmem>>, %arg7: memref<1x128xi32, #tpu.memory_space<vmem>>, %arg8: memref<1x128xi32, #tpu.memory_space<vmem>>, %arg9: memref<1x128xf32, #tpu.memory_space<vmem>>, %arg10: memref<8x1xf32, #tpu.memory_space<vmem>>, %arg11: memref<8x128xf32, #tpu.memory_space<vmem>>, %arg12: memref<8x1xf32, #tpu.memory_space<vmem>>, %arg13: memref<8x1xf32, #tpu.memory_space<vmem>>) attributes {dimension_semantics = [#tpu.dimension_semantics<parallel>, #tpu.dimension_semantics<arbitrary>], iteration_bounds = array<i64: 1, 1>, scalar_prefetch = 0 : i64, scratch_operands = 3 : i64, tpu.core_type = #tpu.core_type<tc>, window_params = [{transform_indices = @transform_0, window_bounds = array<i64: 8, 128>}, {transform_indices = @transform_1, window_bounds = array<i64: 128, 128>}, {transform_indices = @transform_2, window_bounds = array<i64: 8, 1>}, {transform_indices = @transform_3, window_bounds = array<i64: 8, 1>}, {transform_indices = @transform_4, window_bounds = array<i64: 8, 1>}, {transform_indices = @transform_5, window_bounds = array<i64: 1, 128>}, {transform_indices = @transform_6, window_bounds = array<i64: 1, 128>}, {transform_indices = @transform_7, window_bounds = array<i64: 1, 128>}, {transform_indices = @transform_8, window_bounds = array<i64: 8, 1>}]} {
    %c0_i32 = arith.constant 0 : i32
    %0 = arith.cmpi eq, %arg1, %c0_i32 : i32
    %1 = arith.extui %0 : i1 to i32
    %c0_i32_0 = arith.constant 0 : i32
    %2 = arith.cmpi ne, %1, %c0_i32_0 : i32
    scf.if %2 {
      %c0_29 = arith.constant 0 : index
      %c0_30 = arith.constant 0 : index
      %46 = vector.load %arg2[%c0_29, %c0_30] : memref<8x128xf32, #tpu.memory_space<vmem>>, vector<8x128xf32>
      %47 = arith.mulf %46, %46 : vector<8x128xf32>
      %cst_31 = arith.constant dense<0.000000e+00> : vector<8xf32>
      %48 = vector.multi_reduction <add>, %47, %cst_31 [1] : vector<8x128xf32> to vector<8xf32>
      %49 = vector.shape_cast %48 : vector<8xf32> to vector<8x1xf32>
      %cst_32 = arith.constant 1.000000e-24 : f32
      %50 = vector.broadcast %cst_32 : f32 to vector<8x1xf32>
      %51 = arith.maximumf %49, %50 : vector<8x1xf32>
      %52 = math.rsqrt %51 : vector<8x1xf32>
      %53 = vector.broadcast %52 : vector<8x1xf32> to vector<8x128xf32>
      %54 = arith.mulf %46, %53 : vector<8x128xf32>
      %cst_33 = arith.constant 5.000000e+01 : f32
      %55 = vector.broadcast %cst_33 : f32 to vector<8x128xf32>
      %56 = arith.mulf %54, %55 : vector<8x128xf32>
      %c0_34 = arith.constant 0 : index
      %c0_35 = arith.constant 0 : index
      %57 = vector.load %arg11[%c0_34, %c0_35] : memref<8x128xf32, #tpu.memory_space<vmem>>, vector<8x128xf32>
      tpu.vector_store %arg11[%c0_34, %c0_35], %56 {strides = array<i32>} : memref<8x128xf32, #tpu.memory_space<vmem>>, vector<8x128xf32>,
      %cst_36 = arith.constant -1.000000e+30 : f32
      %58 = vector.broadcast %cst_36 : f32 to vector<8x1xf32>
      %c0_37 = arith.constant 0 : index
      %c0_38 = arith.constant 0 : index
      %59 = vector.load %arg12[%c0_37, %c0_38] : memref<8x1xf32, #tpu.memory_space<vmem>>, vector<8x1xf32>
      tpu.vector_store %arg12[%c0_37, %c0_38], %58 {strides = array<i32>} : memref<8x1xf32, #tpu.memory_space<vmem>>, vector<8x1xf32>,
      %cst_39 = arith.constant 0.000000e+00 : f32
      %60 = vector.broadcast %cst_39 : f32 to vector<8x1xf32>
      %c0_40 = arith.constant 0 : index
      %c0_41 = arith.constant 0 : index
      %61 = vector.load %arg13[%c0_40, %c0_41] : memref<8x1xf32, #tpu.memory_space<vmem>>, vector<8x1xf32>
      tpu.vector_store %arg13[%c0_40, %c0_41], %60 {strides = array<i32>} : memref<8x1xf32, #tpu.memory_space<vmem>>, vector<8x1xf32>,
    } else {
    }
    %c0 = arith.constant 0 : index
    %c0_1 = arith.constant 0 : index
    %3 = vector.load %arg11[%c0, %c0_1] : memref<8x128xf32, #tpu.memory_space<vmem>>, vector<8x128xf32>
    %c0_2 = arith.constant 0 : index
    %c0_3 = arith.constant 0 : index
    %4 = vector.load %arg3[%c0_2, %c0_3] : memref<128x128xf32, #tpu.memory_space<vmem>>, vector<128x128xf32>
    %cst = arith.constant dense<0.000000e+00> : vector<8x128xf32>
    %5 = tpu.matmul %3, %4, %cst {dimension_numbers = #tpu.dot_dimension_numbers<[1], [1], [0], [0], [0, 0, 1, 0], [], []>} : vector<8x128xf32>, vector<128x128xf32>, vector<8x128xf32> -> vector<8x128xf32>
    %c0_4 = arith.constant 0 : index
    %c0_5 = arith.constant 0 : index
    %6 = vector.load %arg9[%c0_4, %c0_5] : memref<1x128xf32, #tpu.memory_space<vmem>>, vector<1x128xf32>
    %7 = vector.broadcast %6 : vector<1x128xf32> to vector<8x128xf32>
    %8 = arith.mulf %5, %7 : vector<8x128xf32>
    %c0_6 = arith.constant 0 : index
    %c0_7 = arith.constant 0 : index
    %9 = vector.load %arg5[%c0_6, %c0_7] : memref<8x1xi32, #tpu.memory_space<vmem>>, vector<8x1xi32>
    %c0_8 = arith.constant 0 : index
    %c0_9 = arith.constant 0 : index
    %10 = vector.load %arg7[%c0_8, %c0_9] : memref<1x128xi32, #tpu.memory_space<vmem>>, vector<1x128xi32>
    %11 = vector.broadcast %9 : vector<8x1xi32> to vector<8x128xi32>
    %12 = vector.broadcast %10 : vector<1x128xi32> to vector<8x128xi32>
    %13 = arith.cmpi eq, %11, %12 : vector<8x128xi32>
    %c0_10 = arith.constant 0 : index
    %c0_11 = arith.constant 0 : index
    %14 = vector.load %arg6[%c0_10, %c0_11] : memref<8x1xi32, #tpu.memory_space<vmem>>, vector<8x1xi32>
    %c0_12 = arith.constant 0 : index
    %c0_13 = arith.constant 0 : index
    %15 = vector.load %arg8[%c0_12, %c0_13] : memref<1x128xi32, #tpu.memory_space<vmem>>, vector<1x128xi32>
    %16 = vector.broadcast %14 : vector<8x1xi32> to vector<8x128xi32>
    %17 = vector.broadcast %15 : vector<1x128xi32> to vector<8x128xi32>
    %18 = arith.cmpi ne, %16, %17 : vector<8x128xi32>
    %c0_14 = arith.constant 0 : index
    %c0_15 = arith.constant 0 : index
    %19 = vector.load %arg8[%c0_14, %c0_15] : memref<1x128xi32, #tpu.memory_space<vmem>>, vector<1x128xi32>
    %c16_i32 = arith.constant 16 : i32
    %20 = vector.broadcast %c16_i32 : i32 to vector<1x128xi32>
    %21 = arith.cmpi sge, %19, %20 : vector<1x128xi32>
    %22 = arith.andi %13, %18 : vector<8x128xi1>
    %23 = vector.broadcast %21 : vector<1x128xi1> to vector<8x128xi1>
    %24 = arith.ori %22, %23 : vector<8x128xi1>
    %cst_16 = arith.constant -1.000000e+30 : f32
    %25 = vector.broadcast %cst_16 : f32 to vector<8x128xf32>
    %26 = arith.select %24, %25, %8 : vector<8x128xi1>, vector<8x128xf32>
    %c0_17 = arith.constant 0 : index
    %c0_18 = arith.constant 0 : index
    %27 = vector.load %arg12[%c0_17, %c0_18] : memref<8x1xf32, #tpu.memory_space<vmem>>, vector<8x1xf32>
    %cst_19 = arith.constant dense<0xFF800000> : vector<8xf32>
    %28 = vector.multi_reduction <maximumf>, %26, %cst_19 [1] : vector<8x128xf32> to vector<8xf32>
    %29 = vector.shape_cast %28 : vector<8xf32> to vector<8x1xf32>
    %30 = arith.maximumf %27, %29 : vector<8x1xf32>
    %31 = arith.subf %27, %30 : vector<8x1xf32>
    %32 = math.exp %31 : vector<8x1xf32>
    %c0_20 = arith.constant 0 : index
    %c0_21 = arith.constant 0 : index
    %33 = vector.load %arg13[%c0_20, %c0_21] : memref<8x1xf32, #tpu.memory_space<vmem>>, vector<8x1xf32>
    %34 = arith.mulf %32, %33 : vector<8x1xf32>
    %35 = vector.broadcast %30 : vector<8x1xf32> to vector<8x128xf32>
    %36 = arith.subf %26, %35 : vector<8x128xf32>
    %37 = math.exp %36 : vector<8x128xf32>
    %cst_22 = arith.constant dense<0.000000e+00> : vector<8xf32>
    %38 = vector.multi_reduction <add>, %37, %cst_22 [1] : vector<8x128xf32> to vector<8xf32>
    %39 = vector.shape_cast %38 : vector<8xf32> to vector<8x1xf32>
    %40 = arith.addf %34, %39 : vector<8x1xf32>
    %c0_23 = arith.constant 0 : index
    %c0_24 = arith.constant 0 : index
    %41 = vector.load %arg13[%c0_23, %c0_24] : memref<8x1xf32, #tpu.memory_space<vmem>>, vector<8x1xf32>
    tpu.vector_store %arg13[%c0_23, %c0_24], %40 {strides = array<i32>} : memref<8x1xf32, #tpu.memory_space<vmem>>, vector<8x1xf32>,
    %c0_25 = arith.constant 0 : index
    %c0_26 = arith.constant 0 : index
    %42 = vector.load %arg12[%c0_25, %c0_26] : memref<8x1xf32, #tpu.memory_space<vmem>>, vector<8x1xf32>
    tpu.vector_store %arg12[%c0_25, %c0_26], %30 {strides = array<i32>} : memref<8x1xf32, #tpu.memory_space<vmem>>, vector<8x1xf32>,
    %c0_i32_27 = arith.constant 0 : i32
    %43 = arith.cmpi eq, %arg1, %c0_i32_27 : i32
    %44 = arith.extui %43 : i1 to i32
    %c0_i32_28 = arith.constant 0 : i32
    %45 = arith.cmpi ne, %44, %c0_i32_28 : i32
    scf.if %45 {
      %c0_29 = arith.constant 0 : index
      %c0_30 = arith.constant 0 : index
      %46 = vector.load %arg12[%c0_29, %c0_30] : memref<8x1xf32, #tpu.memory_space<vmem>>, vector<8x1xf32>
      %c0_31 = arith.constant 0 : index
      %c0_32 = arith.constant 0 : index
      %47 = vector.load %arg13[%c0_31, %c0_32] : memref<8x1xf32, #tpu.memory_space<vmem>>, vector<8x1xf32>
      %48 = math.log %47 : vector<8x1xf32>
      %49 = arith.addf %46, %48 : vector<8x1xf32>
      %c0_33 = arith.constant 0 : index
      %c0_34 = arith.constant 0 : index
      %50 = vector.load %arg4[%c0_33, %c0_34] : memref<8x1xf32, #tpu.memory_space<vmem>>, vector<8x1xf32>
      %51 = arith.subf %49, %50 : vector<8x1xf32>
      %c0_35 = arith.constant 0 : index
      %c0_36 = arith.constant 0 : index
      %52 = vector.load %arg10[%c0_35, %c0_36] : memref<8x1xf32, #tpu.memory_space<vmem>>, vector<8x1xf32>
      tpu.vector_store %arg10[%c0_35, %c0_36], %51 {strides = array<i32>} : memref<8x1xf32, #tpu.memory_space<vmem>>, vector<8x1xf32>,
    } else {
    }
    return
  }
  func.func @transform_0(%arg0: i32, %arg1: i32) -> (i32, i32) {
    %c0_i32 = arith.constant 0 : i32
    %c0_i32_0 = arith.constant 0 : i32
    return %arg0, %c0_i32 : i32, i32
  }
  func.func @transform_1(%arg0: i32, %arg1: i32) -> (i32, i32) {
    %c0_i32 = arith.constant 0 : i32
    %c0_i32_0 = arith.constant 0 : i32
    return %arg1, %c0_i32 : i32, i32
  }
  func.func @transform_2(%arg0: i32, %arg1: i32) -> (i32, i32) {
    %c0_i32 = arith.constant 0 : i32
    %c0_i32_0 = arith.constant 0 : i32
    return %arg0, %c0_i32 : i32, i32
  }
  func.func @transform_3(%arg0: i32, %arg1: i32) -> (i32, i32) {
    %c0_i32 = arith.constant 0 : i32
    %c0_i32_0 = arith.constant 0 : i32
    return %arg0, %c0_i32 : i32, i32
  }
  func.func @transform_4(%arg0: i32, %arg1: i32) -> (i32, i32) {
    %c0_i32 = arith.constant 0 : i32
    %c0_i32_0 = arith.constant 0 : i32
    return %arg0, %c0_i32 : i32, i32
  }
  func.func @transform_5(%arg0: i32, %arg1: i32) -> (i32, i32) {
    %c0_i32 = arith.constant 0 : i32
    %c0_i32_0 = arith.constant 0 : i32
    return %c0_i32, %arg1 : i32, i32
  }
  func.func @transform_6(%arg0: i32, %arg1: i32) -> (i32, i32) {
    %c0_i32 = arith.constant 0 : i32
    %c0_i32_0 = arith.constant 0 : i32
    return %c0_i32, %arg1 : i32, i32
  }
  func.func @transform_7(%arg0: i32, %arg1: i32) -> (i32, i32) {
    %c0_i32 = arith.constant 0 : i32
    %c0_i32_0 = arith.constant 0 : i32
    return %c0_i32, %arg1 : i32, i32
  }
  func.func @transform_8(%arg0: i32, %arg1: i32) -> (i32, i32) {
    %c0_i32 = arith.constant 0 : i32
    %c0_i32_0 = arith.constant 0 : i32
    return %arg0, %c0_i32 : i32, i32
  }
}

</mosaic_0001>

<bundles_post_ra>
// kernel: tpu_custom_call.1
= control target key start
LH: loop header
LB: loop body
LE: loop exit
PB: predicated region body
PF: predicated region fallthrough
CT: control target
= control target key end

     0   :  { %13 = vsyncpa [#allocation6], 0  ;;  %s218_s30 = smov [#allocation5]   ;;  %s219_s10 = smov 128   ;;  %s304_s0 = inlined_call_operand.vmem [shape: f32[8,128], index: 0, kind: input, shape index: {}]   ;;  %s305_s1 = inlined_call_operand.hbm [shape: f32[128,128], index: 1, kind: input, shape index: {}]   ;;  %s306_s2 = inlined_call_operand.vmem [shape: f32[8,1], index: 2, kind: input, shape index: {}]   ;;  %s307_s3 = inlined_call_operand.vmem [shape: s32[8,1], index: 3, kind: input, shape index: {}]   ;;  %s308_s4 = inlined_call_operand.vmem [shape: s32[8,1], index: 4, kind: input, shape index: {}]   ;;  %s309_s5 = inlined_call_operand.vmem [shape: s32[1,128], index: 5, kind: input, shape index: {}]   ;;  %s310_s6 = inlined_call_operand.vmem [shape: s32[1,128], index: 6, kind: input, shape index: {}]   ;;  %s311_s7 = inlined_call_operand.vmem [shape: f32[1,128], index: 7, kind: input, shape index: {}]   ;;  %s312_s8 = inlined_call_operand.vmem [shape: f32[8,1], index: 8, kind: output, shape index: {}]  }
   0x1   :  { %s20_s29 = sshll.u32 %s305_s1, 4  ;;  %s22_s9 = sshll.u32 %s218_s30, 4  ;;  %s21_s29 = int_to_ptr.hbm [resolvable:$true] %s20_s29  ;;  %s23_s9 = int_to_ptr.vmem [resolvable:$true] %s22_s9 }
   0x2   :  { %s220_s11 = smov 8  }
   0x3   :  { %28 = dma.hbm_to_vmem [thread:$0]  %s21_s29, 2048, %s23_s9, [#allocation6], %s219_s10, %s219_s10, %s220_s11  }
   0x4   :  { %216 = dma.done.wait [#allocation6], 2048  }
   0x5   :  { %217 = vsyncadd [#allocation6], 4294965248  ;;  %v49_v0 = vld [vmem:[%s304_s0] sm:$0xff]  ;;  %v86_v1 = vld [vmem:[#allocation5 + $0x78] sm:$0xff]  ;;  %v221_v20 = vmov 0   ;;  %vm67_vm3 = vcmask 7168  }
   0x6   :  { %v50_v2 = vmul.f32 %v49_v0, %v49_v0  ;;  %87 = vmatpush.xpose.msra.mxu0 %v86_v1  ;;  %v85_v3 = vld [vmem:[#allocation5 + $0x70] sm:$0xff]  ;;  %v84_v4 = vld [vmem:[#allocation5 + $0x68] sm:$0xff]  ;;  %v83_v5 = vld [vmem:[#allocation5 + $0x60] sm:$0xff]  ;;  %179 = vset.pattern.permute.xlu1 %v221_v20  ;;  %v222_v32 = vmov -1e+30   ;;  %v223_v44 = vmov 0.0  }
   0x7   :  { %v82_v6 = vld [vmem:[#allocation5 + $0x58] sm:$0xff]  ;;  %v81_v7 = vld [vmem:[#allocation5 + $0x50] sm:$0xff]  ;;  %v80_v8 = vld [vmem:[#allocation5 + $0x48] sm:$0xff]  ;;  %178 = vset.pattern.permute.xlu0 %v221_v20  ;;  %180 = vset.pattern.permute.xlu2 %v221_v20  ;;  %68 = vst.msk [vmem:[#allocation3] sm:$0xff] %vm67_vm3, %v222_v32 }
   0x8   :  { %51 = vadd.xlane.f32.xlu0 %v50_v2  ;;  %v79_v9 = vld [vmem:[#allocation5 + $0x40] sm:$0xff]  ;;  %v78_v10 = vld [vmem:[#allocation5 + $0x38] sm:$0xff]  ;;  %v77_v11 = vld [vmem:[#allocation5 + $0x30] sm:$0xff]  ;;  %69 = vst.msk [vmem:[#allocation4] sm:$0xff] %vm67_vm3, %v223_v44 }
   0x9   :  { %v76_v12 = vld [vmem:[#allocation5 + $0x28] sm:$0xff]  ;;  %v75_v13 = vld [vmem:[#allocation5 + $0x20] sm:$0xff]  ;;  %v74_v14 = vld [vmem:[#allocation5 + $0x18] sm:$0xff] }
   0xa   :  { %88 = vmatpush.xpose.msra.mxu0 %v85_v3  ;;  %v73_v15 = vld [vmem:[#allocation5 + $0x10] sm:$0xff]  ;;  %v72_v16 = vld [vmem:[#allocation5 + $0x8] sm:$0xff]  ;;  %v71_v17 = vld [vmem:[#allocation5] sm:$0xff] }
   0xb   :  { %v119_v18 = vld [vmem:[%s308_s4] sm:$0xff] }
   0xc   :  { %v112_v19 = vld [vmem:[%s307_s3] sm:$0xff]  ;;  %122 = vperm.xlu1 %179, %v119_v18  }
   0xd   :  { %v120_v33 = vld [vmem:[%s310_s6] sm:$0x1] }
   0xe   :  { %89 = vmatpush.xpose.msra.mxu0 %v84_v4  ;;  %vm126_vm4 = vcmp.ge.s32.totalorder %v120_v33, 16  ;;  %v181_v34 = vld [vmem:[%s310_s6] ss:$0 sm:$0xff] }
   0xf   :  { %v182_v35 = vld [vmem:[%s309_s5] ss:$0 sm:$0xff]  ;;  %v128_v36 = vsel %vm126_vm4, 1, %v221_v20  ;;  %v140_v55 = vld [vmem:[#allocation4] sm:$0xff] }
  0x10   :  { %v129_v39 = vperm.slane %v128_v36, 0  ;;  %v183_v40 = vld [vmem:[%s311_s7] ss:$0 sm:$0xff] }
  0x11   :  { %v133_v45 = vld [vmem:[#allocation3] sm:$0xff] }
  0x12   :  { %90 = vmatpush.xpose.msra.mxu0 %v83_v5  ;;  %vm130_vm8 = vcmp.eq.s32.totalorder %v129_v39, 1  ;;  %v164_v63 = vld [vmem:[%s306_s2] sm:$0xff] }
  0x16   :  { %91 = vmatpush.xpose.msra.mxu0 %v82_v6 }
  0x1a   :  { %92 = vmatpush.xpose.msra.mxu0 %v81_v7 }
  0x1c   :  { %115 = vperm.xlu0 %178, %v112_v19  }
  0x1e   :  { %93 = vmatpush.xpose.msra.mxu0 %v80_v8 }
  0x22   :  { %94 = vmatpush.xpose.msra.mxu0 %v79_v9 }
  0x26   :  { %95 = vmatpush.xpose.msra.mxu0 %v78_v10 }
  0x2a   :  { %96 = vmatpush.xpose.msra.mxu0 %v77_v11 }
  0x2e   :  { %97 = vmatpush.xpose.msra.mxu0 %v76_v12 }
  0x32   :  { %98 = vmatpush.xpose.msra.mxu0 %v75_v13 }
  0x36   :  { %99 = vmatpush.xpose.msra.mxu0 %v74_v14 }
  0x3a   :  { %100 = vmatpush.xpose.msra.mxu0 %v73_v15 }
  0x3e   :  { %101 = vmatpush.xpose.msra.mxu0 %v72_v16 }
  0x42   :  { %102 = vmatpush.xpose.msra.mxu0 %v71_v17 }
  0x7b   :  { %v52_v21 = vpop.xlane.xlu0 %51 }
  0x7c   :  { %v53_v22 = vmax.f32 %v52_v21, 1e-24 }
  0x7e   :  { %184 = vrsqrt.f32 %v53_v22  ;;  %vm60_vm1 = vweird.f32 %v53_v22  ;;  %v123_v37 = vpop.permute.xlu1 %122 }
  0x7f   :  { %vm125_vm5 = vcmp.ne.s32.totalorder %v123_v37, %v181_v34 }
  0x84   :  { %v185_v23 = vpop.eup %184 }
  0x85   :  { %v55_v24 = vmul.f32 %v185_v23, %v53_v22  ;;  %vm61_vm0 = vweird.f32 %v185_v23 }
  0x86   :  { %vm62_vm2 = vmor %vm60_vm1, %vm61_vm0 }
  0x87   :  { %v56_v25 = vmul.f32 %v185_v23, %v55_v24 }
  0x89   :  { %v57_v26 = vmul.f32 0.5, %v56_v25 }
  0x8b   :  { %v58_v27 = vsub.f32 1.5, %v57_v26 }
  0x8d   :  { %v59_v28 = vmul.f32 %v185_v23, %v58_v27 }
  0x8e   :  { %v116_v38 = vpop.permute.xlu0 %115 }
  0x8f   :  { %v63_v29 = vsel %vm62_vm2, %v185_v23, %v59_v28  ;;  %vm118_vm6 = vcmp.eq.s32.totalorder %v116_v38, %v182_v35 }
  0x90   :  { %v64_v30 = vmul.f32 %v63_v29, %v49_v0  ;;  %vm127_vm7 = vmand %vm118_vm6, %vm125_vm5 }
  0x91   :  { %vm131_vm9 = vmor %vm127_vm7, %vm130_vm8 }
  0x92   :  { %v65_v31 = vmul.f32 50.0, %v64_v30 }
  0x94   :  { %103 = vmatmul.f32.vlgmr.msra.gmra.mxu0 %v65_v31 }
 0x111   :  { %v104_v41 = vpop.f32.mrf.mxu0 }
 0x112   :  { %v111_v42 = vmul.f32 %v183_v40, %v104_v41 }
 0x114   :  { %v132_v43 = vsel %vm131_vm9, -1e+30, %v111_v42 }
 0x115   :  { %134 = vmax.xlane.f32.xlu1 %v132_v43 }
 0x188   :  { %v135_v46 = vpop.xlane.xlu1 %134 }
 0x189   :  { %v136_v47 = vmax.f32 %v133_v45, %v135_v46 }
 0x18b   :  { %v137_v48 = vsub.f32 %v133_v45, %v136_v47  ;;  %155 = vst.msk [vmem:[#allocation3] sm:$0xff] %vm67_vm3, %v136_v47  ;;  %144 = vperm.xlu2 %180, %v136_v47  }
 0x18d   :  { %v138_v53 = vmul.f32 1.442695, %v137_v48 }
 0x192   :  { %v159_v62 = vld [vmem:[#allocation3] sm:$0xff] }
 0x1e5   :  { %v145_v49 = vpop.permute.xlu2 %144 }
 0x1e6   :  { %v147_v50 = vsub.f32 %v132_v43, %v145_v49 }
 0x1e8   :  { %v148_v51 = vmul.f32 1.442695, %v147_v50 }
 0x1ea   :  { %186 = vpow2.f32 %v148_v51 }
 0x1eb   :  { %188 = vpow2.f32 %v138_v53 }
 0x1f0   :  { %v187_v52 = vpop.eup %186 }
 0x1f1   :  { %150 = vadd.xlane.f32.xlu2 %v187_v52  ;;  %v189_v54 = vpop.eup %188 }
 0x1f2   :  { %v141_v56 = vmul.f32 %v189_v54, %v140_v55 }
 0x264   :  { %v151_v57 = vpop.xlane.xlu2 %150 }
 0x265   :  { %v152_v58 = vadd.f32 %v151_v57, %v141_v56 }
 0x267   :  { %154 = vst.msk [vmem:[#allocation4] sm:$0xff] %vm67_vm3, %v152_v58 }
 0x26e   :  { %v160_v59 = vld [vmem:[#allocation4] sm:$0xff] }
 0x26f   :  { %190 = vlog2.f32 %v160_v59 }
 0x275   :  { %v191_v60 = vpop.eup %190 }
 0x276   :  { %v162_v61 = vmul.f32 0.6931472, %v191_v60 }
 0x278   :  { %v163_v0 = vadd.f32 %v162_v61, %v159_v62 }
 0x27a   :  { %v165_v1 = vsub.f32 %v163_v0, %v164_v63 }
 0x27c   :  { %166 = vst.msk [vmem:[%s312_s8] sm:$0xff] %vm67_vm3, %v165_v1 }
 0x27d   :  { %171 = vsyncpa [#allocation6], 1 }

</bundles_post_ra>
